<compile_context>
chip_gen: v7x
topology: tpu7x:2x2x1
jax: 0.10.0
libtpu: 0.0.40
codegen_flags: <defaults>
</compile_context>

<pallas_src>
import math

import numpy as np
import jax
import jax.numpy as jnp
from jax.experimental import pallas as pl
from jax.experimental.pallas import tpu as pltpu


def _round_up(x, m):
    return ((int(x) + m - 1) // m) * m


def _cdiv(a, b):
    return (int(a) + b - 1) // b


# ----------------------------- kernels -------------------------------------

def _gmm_kernel_single_k(eid_ref, x_ref, w_ref, b_ref, o_ref):
    """Grid (token-tile i, N-tile j): whole-K contraction in one MXU call.

    x_ref: (tm, K_pad)   expert-uniform activation row block (reused over j)
    w_ref: (1, K_pad, tn) weight tile of the owning expert
    b_ref: (1, 1, tn)     f32 bias tile of that expert
    o_ref: (tm, tn)       output tile
    """
    acc = jnp.dot(x_ref[...], w_ref[0], preferred_element_type=jnp.float32)
    o_ref[...] = (acc + b_ref[0].astype(jnp.float32)).astype(o_ref.dtype)


def _gmm_kernel_k_reduce(eid_ref, x_ref, w_ref, b_ref, o_ref, acc_ref):
    """Grid (i, j, k): K-reduction with an f32 VMEM accumulator (K > tk_cap)."""
    k = pl.program_id(2)

    @pl.when(k == 0)
    def _init():
        acc_ref[...] = jnp.zeros_like(acc_ref)

    acc_ref[...] += jnp.dot(x_ref[...], w_ref[0],
                            preferred_element_type=jnp.float32)

    @pl.when(k == pl.num_programs(2) - 1)
    def _finalize():
        o_ref[...] = (acc_ref[...] + b_ref[0].astype(jnp.float32)
                      ).astype(o_ref.dtype)


# ----------------------------- wrapper --------------------------------------

def parallel_experts_forward(inputs, expert_size, w, b=None, *,
                             tm=None, compute_dtype=jnp.bfloat16,
                             tm_cap=512, tk_cap=2048, tn_cap=1024):
    """Pallas implementation of ParallelExperts.forward.

    inputs:      (T, K) jnp array (rows grouped contiguously by expert)
    expert_size: concrete int array/list of length E, sum == T
    w:           (E, K, N)
    b:           (E, N) or None
    tm:          token row-tile size (multiple of 8); None -> adaptive
    compute_dtype: matmul operand dtype (default bf16); accumulation is f32
    returns:     (T, N) in inputs.dtype
    """
    expert_size = np.asarray(jax.device_get(expert_size)).astype(np.int64)
    T, K = inputs.shape
    E, K2, N = w.shape
    assert K == K2 and expert_size.shape == (E,)
    assert int(expert_size.sum()) == T
    out_dtype = inputs.dtype
    if b is None:
        b = jnp.zeros((E, N), jnp.float32)

    if T == 0:
        return jnp.zeros((0, N), out_dtype)

    # ---- adaptive row tile: amortize step overhead / weight DMA, but avoid
    #      excessive padding waste for small expert groups ----
    if tm is None:
        nz = expert_size[expert_size > 0]
        mean_tok = float(nz.mean()) if nz.size else 1.0
        tm = int(min(tm_cap, max(128, _round_up(math.ceil(mean_tok), 128))))
    assert tm % 8 == 0

    # ---- K / N tiling (balanced, lane/sublane friendly) ----
    if K <= tk_cap:
        tk = _round_up(K, 8)
        K_pad = tk
        k_tiles = 1
    else:
        k_tiles = _cdiv(K, tk_cap)
        tk = _round_up(_cdiv(K, k_tiles), 128)
        K_pad = tk * k_tiles
    if N <= tn_cap:
        tn = _round_up(N, 128)
        N_pad = tn
        n_tiles = 1
    else:
        n_tiles = _cdiv(N, tn_cap)
        tn = _round_up(_cdiv(N, n_tiles), 128)
        N_pad = tn * n_tiles
    multi_k = k_tiles > 1

    # ---- host-side schedule: expert-uniform token tiles (expert_size concrete) ----
    starts = np.concatenate([[0], np.cumsum(expert_size)[:-1]]).astype(np.int64)
    padded_sizes = ((expert_size + tm - 1) // tm) * tm       # 0 if expert empty
    pad_starts = np.concatenate([[0], np.cumsum(padded_sizes)[:-1]]).astype(np.int64)
    T_pad = int(padded_sizes.sum())
    num_tiles = T_pad // tm
    tile_eid = np.repeat(np.arange(E, dtype=np.int32),
                         (padded_sizes // tm).astype(np.int64))

    rows_aligned = (T_pad == T)   # every expert size is a multiple of tm
    if rows_aligned:
        src_idx = out_idx = None
    else:
        src_idx = np.zeros(T_pad, dtype=np.int32)   # padded-row -> source row
        out_idx = np.zeros(T, dtype=np.int32)       # original row -> padded row
        for e in range(E):
            sz = int(expert_size[e])
            psz = int(padded_sizes[e])
            if sz == 0:
                continue
            js = np.arange(psz)
            src_idx[pad_starts[e]:pad_starts[e] + psz] = (
                starts[e] + np.minimum(js, sz - 1))
            out_idx[starts[e]:starts[e] + sz] = pad_starts[e] + np.arange(sz)

    # ---- device-side data prep (gather / pad only when needed) ----
    x_p = inputs if rows_aligned else jnp.take(inputs, jnp.asarray(src_idx), axis=0)
    x_p = x_p.astype(compute_dtype)
    if K_pad > K:
        x_p = jnp.pad(x_p, ((0, 0), (0, K_pad - K)))
    # TODO(synk): hoist this full-weight pad+cast out of the per-call path
    # (store pre-padded / pre-cast weights in the param pytree at init time).
    w_p = w
    if K_pad > K or N_pad > N:
        w_p = jnp.pad(w_p, ((0, 0), (0, K_pad - K), (0, N_pad - N)))
    w_p = w_p.astype(compute_dtype)
    b_p = b
    if N_pad > N:
        b_p = jnp.pad(b_p, ((0, 0), (0, N_pad - N)))
    b_p = b_p.astype(jnp.float32).reshape(E, 1, N_pad)
    tile_eid_dev = jnp.asarray(tile_eid, dtype=jnp.int32)

    # ---- specs / grid ----
    if multi_k:
        grid = (num_tiles, n_tiles, k_tiles)
        in_specs = [
            pl.BlockSpec((tm, tk), lambda i, j, k, eid: (i, k)),
            pl.BlockSpec((1, tk, tn), lambda i, j, k, eid: (eid[i], k, j)),
            pl.BlockSpec((1, 1, tn), lambda i, j, k, eid: (eid[i], 0, j)),
        ]
        out_spec = pl.BlockSpec((tm, tn), lambda i, j, k, eid: (i, j))
        scratch = [pltpu.VMEM((tm, tn), jnp.float32)]
        kernel = _gmm_kernel_k_reduce
        dims = ("parallel", "parallel", "arbitrary")
        x_block_k = tk
        acc_bytes = tm * tn * 4
    else:
        grid = (num_tiles, n_tiles)
        in_specs = [
            # activation row block fetched once per token tile, reused over j
            pl.BlockSpec((tm, K_pad), lambda i, j, eid: (i, 0)),
            pl.BlockSpec((1, K_pad, tn), lambda i, j, eid: (eid[i], 0, j)),
            pl.BlockSpec((1, 1, tn), lambda i, j, eid: (eid[i], 0, j)),
        ]
        out_spec = pl.BlockSpec((tm, tn), lambda i, j, eid: (i, j))
        scratch = []
        kernel = _gmm_kernel_single_k
        dims = ("parallel", "parallel")
        x_block_k = K_pad
        acc_bytes = 0

    # VMEM budget: actual double-buffered working set + ~25% headroom
    # (safe on v7x's 64 MiB VMEM; well under the caps on v5e/v6e).
    cbytes = jnp.dtype(compute_dtype).itemsize
    obytes = jnp.dtype(out_dtype).itemsize
    est = (2 * tm * x_block_k * cbytes        # activations (double-buffered)
           + 2 * (1 if multi_k else 1) * tk * tn * cbytes if multi_k
           else 2 * tm * x_block_k * cbytes)  # placeholder, recomputed below
    est = (2 * tm * x_block_k * cbytes
           + 2 * (tk if multi_k else K_pad) * tn * cbytes
           + 2 * tn * 4
           + 2 * tm * tn * obytes
           + acc_bytes)
    vmem_limit = int(min(48 * 1024 * 1024,
                         max(est * 5 // 4 + (2 << 20), 16 * 1024 * 1024)))

    out = pl.pallas_call(
        kernel,
        out_shape=jax.ShapeDtypeStruct((T_pad, N_pad), out_dtype),
        grid_spec=pltpu.PrefetchScalarGridSpec(
            num_scalar_prefetch=1,
            grid=grid,
            in_specs=in_specs,
            out_specs=out_spec,
            scratch_shapes=scratch,
        ),
        compiler_params=pltpu.CompilerParams(
            dimension_semantics=dims,
            vmem_limit_bytes=vmem_limit,
        ),
    )(tile_eid_dev, x_p, w_p, b_p)

    # Drop per-expert padding rows / padded N columns only when present.
    result = out if rows_aligned else jnp.take(out, jnp.asarray(out_idx), axis=0)
    if N_pad > N:
        result = result[:, :N]
    return result


# ----------------------------- reference ------------------------------------

def _reference(inputs, expert_size, w, b):
    """Pure-JAX reference mirroring the torch.mm loop."""
    expert_size = np.asarray(expert_size, dtype=np.int64)
    outs = []
    off = 0
    for e, sz in enumerate(expert_size):
        sz = int(sz)
        outs.append(inputs[off:off + sz] @ w[e] + b[e])
        off += sz
    return jnp.concatenate(outs, axis=0)


if __name__ == "__main__":
    key = jax.random.PRNGKey(0)
    num_experts, input_size, output_size = 4, 64, 128

    bound = 1.0 / math.sqrt(input_size)
    k1, k2, k3 = jax.random.split(key, 3)
    w = jax.random.uniform(
        k1, (num_experts, input_size, output_size),
        minval=-bound, maxval=bound, dtype=jnp.float32)
    b = jax.random.uniform(
        k2, (num_experts, output_size),
        minval=-bound, maxval=bound, dtype=jnp.float32)

    # Case 1: small ragged groups, f32 operands (exact path, single-K kernel).
    expert_size = np.array([3, 5, 7, 9], dtype=np.int64)   # T = 24
    T = int(expert_size.sum())
    inputs = jax.random.normal(k3, (T, input_size), dtype=jnp.float32)
    out = jax.block_until_ready(
        parallel_experts_forward(inputs, expert_size, w, b,
                                 compute_dtype=jnp.float32))
    ref = _reference(inputs, expert_size, w, b)
    np.testing.assert_allclose(np.asarray(out), np.asarray(ref),
                               rtol=1e-4, atol=1e-4)

    # Case 2: multi-tile expert + an empty expert, default bf16 operands.
    expert_size2 = np.array([140, 0, 37, 23], dtype=np.int64)  # T = 200
    T2 = int(expert_size2.sum())
    inputs2 = jax.random.normal(jax.random.PRNGKey(1), (T2, input_size),
                                dtype=jnp.float32)
    out2 = jax.block_until_ready(
        parallel_experts_forward(inputs2, expert_size2, w, b))
    ref2 = _reference(inputs2, expert_size2, w, b)
    np.testing.assert_allclose(np.asarray(out2), np.asarray(ref2),
                               rtol=2e-2, atol=2e-2)

    # Case 3: exercise the K-reduction kernel and multiple N tiles with tiny
    # tile caps (production caps are tk=2048 / tn=1024).
    K3, N3 = 256, 256
    w3 = jax.random.uniform(jax.random.PRNGKey(2), (num_experts, K3, N3),
                            minval=-bound, maxval=bound, dtype=jnp.float32)
    b3 = jax.random.uniform(jax.random.PRNGKey(3), (num_experts, N3),
                            minval=-bound, maxval=bound, dtype=jnp.float32)
    expert_size3 = np.array([17, 40, 0, 7], dtype=np.int64)    # T = 64
    inputs3 = jax.random.normal(jax.random.PRNGKey(4),
                                (int(expert_size3.sum()), K3),
                                dtype=jnp.float32)
    out3 = jax.block_until_ready(
        parallel_experts_forward(inputs3, expert_size3, w3, b3,
                                 compute_dtype=jnp.float32,
                                 tk_cap=128, tn_cap=128))
    ref3 = _reference(inputs3, expert_size3, w3, b3)
    np.testing.assert_allclose(np.asarray(out3), np.asarray(ref3),
                               rtol=1e-4, atol=1e-4)

    print("KERNEL_OK")
</pallas_src>

<mosaic_0001>
module attributes {stable_mosaic.version = 11 : i64} {
  func.func @_gmm_kernel_single_k(%arg0: i32, %arg1: i32, %arg2: memref<4xi32, #tpu.memory_space<smem>>, %arg3: memref<128x64xf32, #tpu.memory_space<vmem>>, %arg4: memref<1x64x128xf32, #tpu.memory_space<vmem>>, %arg5: memref<1x1x128xf32, #tpu.memory_space<vmem>>, %arg6: memref<128x128xf32, #tpu.memory_space<vmem>>) attributes {dimension_semantics = [#tpu.dimension_semantics<parallel>, #tpu.dimension_semantics<parallel>], iteration_bounds = array<i64: 4, 1>, scalar_prefetch = 1 : i64, scratch_operands = 0 : i64, tpu.core_type = #tpu.core_type<tc>, window_params = [{transform_indices = @transform_0, window_bounds = array<i64: 128, 64>}, {transform_indices = @transform_1, window_bounds = array<i64: 1, 64, 128>}, {transform_indices = @transform_2, window_bounds = array<i64: 1, 1, 128>}, {transform_indices = @transform_3, window_bounds = array<i64: 128, 128>}]} {
    %c0 = arith.constant 0 : index
    %c0_0 = arith.constant 0 : index
    %0 = vector.load %arg3[%c0, %c0_0] : memref<128x64xf32, #tpu.memory_space<vmem>>, vector<128x64xf32>
    %c0_1 = arith.constant 0 : index
    %c0_2 = arith.constant 0 : index
    %c0_3 = arith.constant 0 : index
    %1 = vector.load %arg4[%c0_1, %c0_2, %c0_3] : memref<1x64x128xf32, #tpu.memory_space<vmem>>, vector<1x64x128xf32>
    %2 = vector.shape_cast %1 : vector<1x64x128xf32> to vector<64x128xf32>
    %cst = arith.constant dense<0.000000e+00> : vector<128x128xf32>
    %3 = tpu.matmul %0, %2, %cst {dimension_numbers = #tpu.dot_dimension_numbers<[1], [0], [0], [1], [0, 0, 1, 1], [], []>} : vector<128x64xf32>, vector<64x128xf32>, vector<128x128xf32> -> vector<128x128xf32>
    %c0_4 = arith.constant 0 : index
    %c0_5 = arith.constant 0 : index
    %c0_6 = arith.constant 0 : index
    %4 = vector.load %arg5[%c0_4, %c0_5, %c0_6] : memref<1x1x128xf32, #tpu.memory_space<vmem>>, vector<1x1x128xf32>
    %5 = vector.shape_cast %4 : vector<1x1x128xf32> to vector<1x128xf32>
    %6 = vector.broadcast %5 : vector<1x128xf32> to vector<128x128xf32>
    %7 = arith.addf %3, %6 : vector<128x128xf32>
    %c0_7 = arith.constant 0 : index
    %c0_8 = arith.constant 0 : index
    %8 = vector.load %arg6[%c0_7, %c0_8] : memref<128x128xf32, #tpu.memory_space<vmem>>, vector<128x128xf32>
    tpu.vector_store %arg6[%c0_7, %c0_8], %7 {strides = array<i32>} : memref<128x128xf32, #tpu.memory_space<vmem>>, vector<128x128xf32>,
    return
  }
  func.func @transform_0(%arg0: i32, %arg1: i32, %arg2: memref<4xi32, #tpu.memory_space<smem>>) -> (i32, i32) {
    %c0_i32 = arith.constant 0 : i32
    %c0_i32_0 = arith.constant 0 : i32
    return %arg0, %c0_i32 : i32, i32
  }
  func.func @transform_1(%arg0: i32, %arg1: i32, %arg2: memref<4xi32, #tpu.memory_space<smem>>) -> (i32, i32, i32) {
    %0 = arith.index_cast %arg0 : i32 to index
    %1 = memref.load %arg2[%0] : memref<4xi32, #tpu.memory_space<smem>>
    %c0_i32 = arith.constant 0 : i32
    %c0_i32_0 = arith.constant 0 : i32
    return %1, %c0_i32, %arg1 : i32, i32, i32
  }
  func.func @transform_2(%arg0: i32, %arg1: i32, %arg2: memref<4xi32, #tpu.memory_space<smem>>) -> (i32, i32, i32) {
    %0 = arith.index_cast %arg0 : i32 to index
    %1 = memref.load %arg2[%0] : memref<4xi32, #tpu.memory_space<smem>>
    %c0_i32 = arith.constant 0 : i32
    %c0_i32_0 = arith.constant 0 : i32
    return %1, %c0_i32, %arg1 : i32, i32, i32
  }
  func.func @transform_3(%arg0: i32, %arg1: i32, %arg2: memref<4xi32, #tpu.memory_space<smem>>) -> (i32, i32) {
    %c0_i32 = arith.constant 0 : i32
    return %arg0, %arg1 : i32, i32
  }
}

</mosaic_0001>

<bundles_post_ra>
// kernel: tpu_custom_call.1
= control target key start
LH: loop header
LB: loop body
LE: loop exit
PB: predicated region body
PF: predicated region fallthrough
CT: control target
= control target key end

     0   :  { %s1106_s0 = inlined_call_operand.vmem [shape: s32[4], index: 0, kind: input, shape index: {}]   ;;  %s1107_s1 = inlined_call_operand.vmem [shape: f32[512,64], index: 1, kind: input, shape index: {}]   ;;  %s1108_s2 = inlined_call_operand.vmem [shape: f32[4,64,128], index: 2, kind: input, shape index: {}]   ;;  %s1109_s3 = inlined_call_operand.vmem [shape: f32[4,1,128], index: 3, kind: input, shape index: {}]   ;;  %s1110_s4 = inlined_call_operand.hbm [shape: f32[512,128], index: 4, kind: output, shape index: {}]  }
   0x1   :  { %s9_s17 = sshll.u32 %s1106_s0, 4  ;;  %s10_s17 = int_to_ptr.vmem [resolvable:$true] %s9_s17 }
   0x2   :  { %s801_s18 = scalar_lea.vmem %s10_s17, 16  ;;  %p806_p1 = scmp.lt.s32.totalorder %s10_s17, %s10_s17 }
   0x3   :  { %p802_p0 = scmp.ne.s32.totalorder %s10_s17, %s801_s18  ;;  %p807_p2 = scmp.lt.s32.totalorder %s801_s18, %s801_s18 }
   0x5   :  { %p808_p3 = por %p807_p2, %p806_p1 }
   0x7   :  { %p809_p4 = pnand %p808_p3, %p802_p0 }
   0x9   :  { %812 = shalt.err (!%p809_p4)  }
   0xa   :  { %s895_s19 = smov [#allocation3]  }
   0xb   :  { %12 = dma.vmem_to_smem %s10_s17, 16, %s895_s19, [#allocation2] }
   0xc   :  { %865 = dma.done.wait [#allocation2], 16 }
   0xd   :  { %866 = vsyncadd [#allocation2], 4294967280 }
   0xe   :  { %14 = sfence }
   0xf   :  { %15 = vsyncpa [#allocation5], 0 }
  0x10   :  { %17 = vsyncpa [#allocation5 + $0x1], 0  ;;  %s927_s20 = smov 0   ;;  %s929_s21 = smov 0  }
  0x11   :  { %s931_s0 = smov 0   ;;  %s933_s22 = smov 0  }
  0x12   :  { %s935_s23 = smov 0   ;;  %s937_s24 = smov 0  }
  0x13 LB: > { %s621_s25 = sadd.s32 4294967295, %s893_s24   ;;  %s622_s26 = sadd.s32 4294967294, %s893_s24   ;;  %s893_s24 = sphi %s937_s24, %s23_s24   ;;  %s889_s23 = sphi %s935_s23, %s1117_s23   ;;  %s885_s22 = sphi %s933_s22, %s1116_s22   ;;  %s881_s0 = sphi %s931_s0, %s1115_s0   ;;  %s877_s21 = sphi %s929_s21, %s1114_s21   ;;  %s873_s20 = sphi %s927_s20, %s1113_s20  }
  0x14   : > { %s35_s27 = sadd.s32 1, %s889_s23  ;;  %s130_s28 = sadd.s32 1, %s881_s0 }
  0x15   : > { %p37_p5 = scmp.ge.s32.totalorder %s35_s27, 4  ;;  %p140_p6 = scmp.ne.s32.totalorder %s881_s0, %s877_s21 }
  0x16   : > { %p141_p7 = scmp.eq.s32.totalorder %s621_s25, 3  ;;  %p146_p8 = scmp.ne.s32.totalorder %s877_s21, %s873_s20 }
  0x17   : > { %s1119_s27 = smov (%p37_p5, %s35_s27), 0  ;;  %p147_p10 = scmp.eq.s32.totalorder %s622_s26, 3 }
  0x18   : > { %p967_p9 = por %p141_p7, %p140_p6  ;;  %s125_s30 = ssub.s32 %s889_s23, %s1119_s27 }
  0x19   : > { %p625_p11 = scmp.ge.s32.totalorder %s893_s24, 1  ;;  %p128_p12 = scmp.eq.s32.totalorder %s125_s30, 0 }
  0x1a   : > { %p974_p13 = por %p147_p10, %p146_p8  ;;  %p198_p0 = scmp.lt.s32.totalorder %s893_s24, 5 }
  0x1b   : > { %s980_s6 = scalar_select %p128_p12, %s881_s0, %s130_s28  }
  0x1c   : > { %p199_p1 = pnand %p625_p11, %p198_p0 }
  0x1d   : > { %s244_s7 = sld [smem:[#allocation3 + %s885_s22]] (!%p199_p1)  ;;  %s627_s8 = sshll.u32 (!%p199_p1), %s885_s22, 4  ;;  %vm294_vm0 = vcmask (!%p199_p1), 523264  }
  0x1e   : > { %202 = sbr.rel (%p199_p1) target bundleno = 303 (0x12f), region = 32  ;;  %p239_p2 = scmp.lt.s32.totalorder (!%p199_p1), %s627_s8, 63 }
  0x1f   : > { %s254_s17 = sld [smem:[#allocation3 + %s885_s22]] (!%p199_p1)  ;;  %s235_s18 = sand.u32 (!%p199_p1), 1, %s877_s21  }
  0x20   : > { %s626_s28 = sshll.u32 (!%p199_p1), %s235_s18, 7  ;;  %s1060_s11 = scalar_lea.sflag (!%p199_p1), [#allocation5], %s235_s18 }
  0x21   : > { %s1031_s30 = scalar_lea.vmem (!%p199_p1), [#allocation4], %s626_s28 }
  0x23   : > { %p245_p3 = scmp.lt.s32.totalorder (!%p199_p1), %s244_s7, 3 }
  0x25   : > { %s1121_s8 = smov (!%p239_p2, %s627_s8), 63  ;;  %s1123_s7 = smov (!%p245_p3, %s244_s7), 3 }
  0x26   : > { %s628_s9 = sshll.u32 %s1121_s8, 3  ;;  %s653_s13 = sshll.u32 %s1123_s7, 6 }
  0x27   : > { %s987_s12 = scalar_lea.vmem %s1107_s1, %s628_s9  ;;  %s252_s16 = scalar_lea.vmem %s1108_s2, %s653_s13 }
  0x28   : > { %v263_v0 = vld [vmem:[%s987_s12] sm:$0xff]  ;;  %v280_v3 = vld [vmem:[%s252_s16 + $0x8] sm:$0xff]  ;;  %v281_v4 = vld [vmem:[%s252_s16 + $0x10] sm:$0xff]  ;;  %p255_p4 = scmp.lt.s32.totalorder %s254_s17, 3  ;;  %s654_s7 = sshll.u32 %s885_s22, 11 }
  0x29   : > { %v271_v1 = vld [vmem:[%s987_s12 + $0x40] sm:$0xff]  ;;  %695 = vmatprep.mubr.msk.f32.mxu0 %vm294_vm0, %v263_v0  ;;  %v282_v6 = vld [vmem:[%s252_s16 + $0x18] sm:$0xff]  ;;  %v284_v9 = vld [vmem:[%s252_s16 + $0x28] sm:$0xff]  ;;  %s519_s8 = sshll.u32 %s1031_s30, 4  ;;  %s1050_s22 = scalar_lea.hbm %s1110_s4, %s654_s7  ;;  %s1052_s8 = int_to_ptr.vmem [resolvable:$true] %s519_s8 }
  0x2a   : > { %707 = vmatprep.mubr.msk.f32.mxu1 %vm294_vm0, %v271_v1  ;;  %v279_v2 = vld [vmem:[%s252_s16] sm:$0xff]  ;;  %v723_v7 = vpack.c.bf16 %v282_v6, %v281_v4  ;;  %v285_v11 = vld [vmem:[%s252_s16 + $0x30] sm:$0xff]  ;;  %v286_v12 = vld [vmem:[%s252_s16 + $0x38] sm:$0xff]  ;;  %s1125_s17 = smov (!%p255_p4, %s254_s17), 3  ;;  %s896_s13 = smov [#allocation4]  }
  0x2b   : > { %v719_v5 = vpack.c.bf16 %v280_v3, %v279_v2  ;;  %v283_v8 = vld [vmem:[%s252_s16 + $0x20] sm:$0xff]  ;;  %v731_v13 = vpack.c.bf16 %v286_v12, %v285_v11  ;;  %v264_v14 = vld [vmem:[%s987_s12 + $0x8] sm:$0xff]  ;;  %v265_v16 = vld [vmem:[%s987_s12 + $0x10] sm:$0xff]  ;;  %s260_s26 = scalar_lea.vmem %s1109_s3, %s1125_s17  ;;  %s817_s14 = sshll.u32 %s896_s13, 4  ;;  %s818_s14 = int_to_ptr.vmem [resolvable:$false] %s817_s14 }
  0x2c   : > { %v727_v10 = vpack.c.bf16 %v284_v9, %v283_v8  ;;  %v272_v15 = vld [vmem:[%s987_s12 + $0x48] sm:$0xff]  ;;  %v273_v17 = vld [vmem:[%s987_s12 + $0x50] sm:$0xff]  ;;  %v266_v18 = vld [vmem:[%s987_s12 + $0x18] sm:$0xff]  ;;  %s819_s15 = scalar_lea.vmem %s818_s14, 4096  ;;  %p820_p8 = scmp.lt.s32.totalorder %s1052_s8, %s818_s14 }
  0x2d   : > { %720 = vmatprep.subr.bf16.mxu0 %v719_v5  ;;  %735 = vmatprep.subr.bf16.mxu1 %v719_v5  ;;  %v274_v19 = vld [vmem:[%s987_s12 + $0x58] sm:$0xff]  ;;  %v267_v20 = vld [vmem:[%s987_s12 + $0x20] sm:$0xff]  ;;  %v268_v22 = vld [vmem:[%s987_s12 + $0x28] sm:$0xff] }
  0x2e   : > { %722 = vmatpush3.bf16.msra.mxu0 %v719_v5  ;;  %739 = vmatpush3.bf16.msra.mxu1 %v719_v5  ;;  %v275_v21 = vld [vmem:[%s987_s12 + $0x60] sm:$0xff]  ;;  %v276_v23 = vld [vmem:[%s987_s12 + $0x68] sm:$0xff]  ;;  %v269_v24 = vld [vmem:[%s987_s12 + $0x30] sm:$0xff] }
  0x2f   : > { %724 = vmatprep.subr.bf16.mxu0 %v723_v7  ;;  %736 = vmatprep.subr.bf16.mxu1 %v723_v7  ;;  %v277_v25 = vld [vmem:[%s987_s12 + $0x70] sm:$0xff]  ;;  %v270_v26 = vld [vmem:[%s987_s12 + $0x38] sm:$0xff]  ;;  %v631_v28 = vld [vmem:[%s260_s26] ss:$0 sm:$0xff] }
  0x30   : > { %v278_v27 = vld [vmem:[%s987_s12 + $0x78] sm:$0xff]  ;;  %s813_s12 = scalar_lea.vmem %s1052_s8, 2048 }
  0x31   : > { %p814_p5 = scmp.ne.s32.totalorder %s1052_s8, %s813_s12  ;;  %p821_p10 = scmp.lt.s32.totalorder %s819_s15, %s813_s12 }
  0x32   : > { %726 = vmatpush3.bf16.msra.mxu0 %v723_v7  ;;  %740 = vmatpush3.bf16.msra.mxu1 %v723_v7 }
  0x33   : > { %728 = vmatprep.subr.bf16.mxu0 %v727_v10  ;;  %737 = vmatprep.subr.bf16.mxu1 %v727_v10  ;;  %p815_p6 = pnand %p814_p5, %p967_p9  ;;  %p822_p11 = por %p821_p10, %p820_p8 }
  0x35   : > { %p816_p7 = pneg %p815_p6 }
  0x36   : > { %730 = vmatpush3.bf16.msra.mxu0 %v727_v10  ;;  %741 = vmatpush3.bf16.msra.mxu1 %v727_v10 }
  0x37   : > { %732 = vmatprep.subr.bf16.mxu0 %v731_v13  ;;  %738 = vmatprep.subr.bf16.mxu1 %v731_v13  ;;  %p823_p12 = pnand %p822_p11, %p816_p7 }
  0x3a   : > { %734 = vmatpush3.bf16.msra.mxu0 %v731_v13  ;;  %742 = vmatpush3.bf16.msra.mxu1 %v731_v13 }
  0x3d   : > { %696 = vmatmul.mubr.msk.f32.vlgmr.msra.gmra.mrb[0].mxu0 %vm294_vm0, %v264_v14  ;;  %708 = vmatmul.mubr.msk.f32.vlgmr.msra.gmra.mrb[0].mxu1 %vm294_vm0, %v272_v15 }
  0x3e   : > { %698 = vmatprep.mubr.msk.f32.mxu0 %vm294_vm0, %v265_v16  ;;  %710 = vmatprep.mubr.msk.f32.mxu1 %vm294_vm0, %v273_v17 }
  0x41   : > { %699 = vmatmul.mubr.msk.f32.gmra.mrb[2].mxu0 %vm294_vm0, %v266_v18  ;;  %711 = vmatmul.mubr.msk.f32.gmra.mrb[2].mxu1 %vm294_vm0, %v274_v19 }
  0x42   : > { %701 = vmatprep.mubr.msk.f32.mxu0 %vm294_vm0, %v267_v20  ;;  %713 = vmatprep.mubr.msk.f32.mxu1 %vm294_vm0, %v275_v21 }
  0x45   : > { %702 = vmatmul.mubr.msk.f32.gmra.mrb[4].mxu0 %vm294_vm0, %v268_v22  ;;  %714 = vmatmul.mubr.msk.f32.gmra.mrb[4].mxu1 %vm294_vm0, %v276_v23 }
  0x46   : > { %704 = vmatprep.mubr.msk.f32.mxu0 %vm294_vm0, %v269_v24  ;;  %716 = vmatprep.mubr.msk.f32.mxu1 %vm294_vm0, %v277_v25 }
  0x49   : > { %705 = vmatmul.mubr.msk.f32.gmra.mrb[6].mxu0 %vm294_vm0, %v270_v26  ;;  %717 = vmatmul.mubr.msk.f32.gmra.mrb[6].mxu1 %vm294_vm0, %v278_v27 }
 0x110   : > { %v697_v29 = vpop.f32.mrb[0].mxu0  ;;  %v709_v30 = vpop.f32.mrb[0].mxu1 }
 0x111   : > { %v415_v31 = vadd.f32 %v697_v29, %v631_v28  ;;  %v455_v32 = vadd.f32 %v709_v30, %v631_v28  ;;  %v409_v33 = vpop.f32.mrb[1].mxu0  ;;  %v449_v34 = vpop.f32.mrb[1].mxu1 }
 0x112   : > { %v410_v35 = vadd.f32 %v631_v28, %v409_v33  ;;  %v450_v36 = vadd.f32 %v631_v28, %v449_v34 }
 0x113   : > { %489 = vst [vmem:[%s1031_s30 + $0x8] sm:$0xff] %v415_v31  ;;  %497 = vst [vmem:[%s1031_s30 + $0x48] sm:$0xff] %v455_v32 }
 0x114   : > { %488 = vst [vmem:[%s1031_s30] sm:$0xff] %v410_v35  ;;  %496 = vst [vmem:[%s1031_s30 + $0x40] sm:$0xff] %v450_v36  ;;  %v700_v37 = vpop.f32.mrb[2].mxu0  ;;  %v712_v38 = vpop.f32.mrb[2].mxu1 }
 0x115   : > { %v425_v39 = vadd.f32 %v700_v37, %v631_v28  ;;  %v465_v40 = vadd.f32 %v712_v38, %v631_v28  ;;  %v419_v41 = vpop.f32.mrb[3].mxu0  ;;  %v459_v42 = vpop.f32.mrb[3].mxu1 }
 0x116   : > { %v420_v43 = vadd.f32 %v631_v28, %v419_v41  ;;  %v460_v44 = vadd.f32 %v631_v28, %v459_v42 }
 0x117   : > { %491 = vst [vmem:[%s1031_s30 + $0x18] sm:$0xff] %v425_v39  ;;  %499 = vst [vmem:[%s1031_s30 + $0x58] sm:$0xff] %v465_v40 }
 0x118   : > { %490 = vst [vmem:[%s1031_s30 + $0x10] sm:$0xff] %v420_v43  ;;  %498 = vst [vmem:[%s1031_s30 + $0x50] sm:$0xff] %v460_v44  ;;  %v703_v45 = vpop.f32.mrb[4].mxu0  ;;  %v715_v46 = vpop.f32.mrb[4].mxu1 }
 0x119   : > { %v435_v47 = vadd.f32 %v703_v45, %v631_v28  ;;  %v475_v48 = vadd.f32 %v715_v46, %v631_v28  ;;  %v429_v49 = vpop.f32.mrb[5].mxu0  ;;  %v469_v50 = vpop.f32.mrb[5].mxu1 }
 0x11a   : > { %v430_v51 = vadd.f32 %v631_v28, %v429_v49  ;;  %v470_v52 = vadd.f32 %v631_v28, %v469_v50 }
 0x11b   : > { %493 = vst [vmem:[%s1031_s30 + $0x28] sm:$0xff] %v435_v47  ;;  %501 = vst [vmem:[%s1031_s30 + $0x68] sm:$0xff] %v475_v48 }
 0x11c   : > { %492 = vst [vmem:[%s1031_s30 + $0x20] sm:$0xff] %v430_v51  ;;  %500 = vst [vmem:[%s1031_s30 + $0x60] sm:$0xff] %v470_v52  ;;  %v706_v53 = vpop.f32.mrb[6].mxu0  ;;  %v718_v54 = vpop.f32.mrb[6].mxu1 }
 0x11d   : > { %v445_v55 = vadd.f32 %v706_v53, %v631_v28  ;;  %v485_v56 = vadd.f32 %v718_v54, %v631_v28  ;;  %v439_v57 = vpop.f32.mrb[7].mxu0  ;;  %v479_v58 = vpop.f32.mrb[7].mxu1 }
 0x11e   : > { %v440_v59 = vadd.f32 %v631_v28, %v439_v57  ;;  %v480_v60 = vadd.f32 %v631_v28, %v479_v58 }
 0x11f   : > { %495 = vst [vmem:[%s1031_s30 + $0x38] sm:$0xff] %v445_v55  ;;  %503 = vst [vmem:[%s1031_s30 + $0x78] sm:$0xff] %v485_v56 }
 0x120   : > { %494 = vst [vmem:[%s1031_s30 + $0x30] sm:$0xff] %v440_v59  ;;  %502 = vst [vmem:[%s1031_s30 + $0x70] sm:$0xff] %v480_v60 }
 0x121   : > { %826 = shalt.err (!%p823_p12)
}
 0x122   : > { %s827_s16 = scalar_lea.hbm %s1050_s22, 2048  ;;  %s831_s19 = scalar_lea.hbm %s1110_s4, 8192 }
 0x123   : > { %p828_p0 = scmp.ne.s32.totalorder %s1050_s22, %s827_s16  ;;  %p832_p3 = scmp.lt.u32.totalorder %s1050_s22, %s1110_s4 }
 0x124   : > { %p833_p4 = scmp.lt.u32.totalorder %s831_s19, %s827_s16  ;;  %p835_p6 = scmp.lt.u32.totalorder %s827_s16, %s1050_s22 }
 0x125   : > { %p829_p1 = pnand %p828_p0, %p967_p9 }
 0x126   : > { %p834_p5 = por %p833_p4, %p832_p3 }
 0x127   : > { %p830_p2 = pneg %p829_p1 }
 0x128   : > { %p836_p7 = por %p835_p6, %p834_p5 }
 0x12a   : > { %p837_p8 = pnand %p836_p7, %p830_p2 }
 0x12c   : > { %840 = shalt.err (!%p837_p8)
}
 0x12d   : > { %s897_s28 = smov 128   ;;  %s898_s30 = smov 8  }
 0x12e   : > { %743 = dma.vmem_to_hbm [thread:$0]  (%p967_p9), %s1052_s8, 2048, %s1050_s22, %s1060_s11, %s897_s28, %s897_s28, %s898_s30  }
 0x12f PF: > { %p749_p10 = scmp.ge.s32.totalorder %s893_s24, 2  ;;  %s534_s7 = sand.u32 1, %s873_s20  }
 0x130   : > { %s535_s9 = scalar_lea.sflag [#allocation5], %s534_s7 }
 0x131   : > { %p746_p11 = pnand %p749_p10, %p974_p13 }
 0x133   : > { %868 = dma.done.wait (!%p746_p11), %s535_s9, 2048  }
 0x134   : > { %870 = vsyncadd (!%p746_p11), %s535_s9, 4294965248  ;;  %s23_s24 = sadd.s32 1, %s893_s24   ;;  %s1113_s20 = smov %s877_s21 }
 0x135   : > { %p20_p12 = scmp.ge.s32.totalorder %s23_s24, 6   ;;  %s1114_s21 = smov %s881_s0 }
 0x136   : > { %s1115_s0 = smov %s980_s6  ;;  %s1116_s22 = smov %s889_s23 }
 0x137   : > { %s1117_s23 = smov %s1119_s27  ;;  %22 = sbr.rel (!%p20_p12) target bundleno = 19 (0x13), region = 73 }
 0x13e   :  { %540 = vsyncpa [#allocation5], 1 }
 0x13f   :  { %542 = vsyncpa [#allocation5 + $0x1], 1 }

</bundles_post_ra>
